<compile_context>
chip_gen: v7x
topology: tpu7x:2x2x1
jax: 0.10.0
libtpu: 0.0.40
codegen_flags: <defaults>
</compile_context>

<pallas_src>
import functools

import jax
import jax.numpy as jnp
from jax import lax
from jax.experimental import pallas as pl
from jax.experimental.pallas import tpu as pltpu


def _heatmap_loss_kernel(p_ref, g_ref, m_ref, o_ref, *, rows, tr,
                         blocks_per_core, needs_mask):
    c = pl.program_id(0)   # core / partial-sum index ("parallel")
    i = pl.program_id(1)   # block index within this core ("arbitrary")

    # Zero this core's resident partial-sum block at the start of its loop.
    @pl.when(i == 0)
    def _():
        o_ref[...] = jnp.zeros_like(o_ref)

    d = (p_ref[...] - g_ref[...]).astype(jnp.float32)
    sq = d * d * m_ref[...].astype(jnp.float32)

    if needs_mask:
        # Mask rows beyond the real array (partial last block and clamped
        # duplicate blocks). Use select (not multiply) so undefined data in
        # Pallas block padding (possibly NaN/Inf) cannot leak into the sum.
        start_row = (c * blocks_per_core + i) * tr
        row_ids = start_row + lax.broadcasted_iota(jnp.int32, sq.shape, 0)
        sq = jnp.where(row_ids < rows, sq, jnp.float32(0.0))

    # Fold groups of 8 rows into a vreg-aligned (8, lane) partial: pure VPU
    # adds (elementwise slab additions), no cross-lane (XLU) work in the hot
    # loop.
    lane = sq.shape[-1]
    part = jnp.sum(sq.reshape(tr // 8, 8, lane), axis=0)
    o_ref[...] += part[None, :, :]


def heatmap_loss(pred, gt, mask, *, num_cores=2,
                 max_block_bytes=2 * 1024 * 1024):
    """pred, gt, mask: [N, C, H, W]. Returns scalar float32 loss."""
    assert pred.shape == gt.shape == mask.shape
    e = int(pred.size)
    inv_count = 1.0 / float(e)

    p = pred.reshape(-1)
    g = gt.reshape(-1)
    m = mask.reshape(-1)

    # Pick a lane-dense width: largest candidate that divides E, preferring
    # rows % 8 == 0 so even small inputs have no partial sublane block.
    lane = None
    for cand in (1024, 512, 256, 128):
        if e % cand == 0 and (e // cand) % 8 == 0:
            lane = cand
            break
    if lane is None:
        for cand in (1024, 512, 256, 128):
            if e % cand == 0:
                lane = cand
                break
    if lane is None:
        # Rare for NCHW heatmaps: zero-pad (one extra copy) to a multiple of
        # 128. Padded zeros contribute 0; inv_count uses the real count.
        lane = 128
        pad = (-e) % lane
        p = jnp.pad(p, (0, pad))
        g = jnp.pad(g, (0, pad))
        m = jnp.pad(m, (0, pad))

    rows = p.size // lane
    p2 = p.reshape(rows, lane)
    g2 = g.reshape(rows, lane)
    m2 = m.reshape(rows, lane)

    def rup(x, mlt):
        return (x + mlt - 1) // mlt * mlt

    # ~2 MiB (f32-equivalent) per input block, multiple of 8 rows.
    tr_cap = max(8, (max_block_bytes // (4 * lane)) // 8 * 8)
    tr = min(tr_cap, rup(max(1, -(-rows // num_cores)), 8))

    nblocks = -(-rows // tr)                    # blocks actually needed
    blocks_per_core = -(-nblocks // num_cores)  # inner grid extent
    max_block = nblocks - 1
    grid = (num_cores, blocks_per_core)

    # Masking is only needed if the last block is partial or if clamped
    # duplicate blocks exist (nblocks not a multiple of the core count).
    needs_mask = (rows % tr != 0) or (nblocks != num_cores * blocks_per_core)

    def in_map(c, i):
        # Clamp so redundant tail iterations re-read the last real block
        # (their contribution is masked to zero inside the kernel).
        return (jnp.minimum(c * blocks_per_core + i, max_block), 0)

    in_spec = pl.BlockSpec((tr, lane), in_map)
    out_spec = pl.BlockSpec((1, 8, lane), lambda c, i: (c, 0, 0))

    kernel = functools.partial(
        _heatmap_loss_kernel, rows=rows, tr=tr,
        blocks_per_core=blocks_per_core, needs_mask=needs_mask)

    partials = pl.pallas_call(
        kernel,
        out_shape=jax.ShapeDtypeStruct((num_cores, 8, lane), jnp.float32),
        grid_spec=pltpu.PrefetchScalarGridSpec(
            num_scalar_prefetch=0,
            grid=grid,
            in_specs=[in_spec, in_spec, in_spec],
            out_specs=out_spec,
        ),
        compiler_params=pltpu.CompilerParams(
            dimension_semantics=("parallel", "arbitrary"),
            vmem_limit_bytes=32 * 1024 * 1024,
        ),
    )(p2, g2, m2)

    # Tiny (num_cores, 8, lane) final reduce + normalization in the wrapper.
    return jnp.sum(partials) * inv_count


if __name__ == "__main__":
    key = jax.random.PRNGKey(0)

    # Main check: standard NCHW heatmap-like shape.
    k1, k2, k3, k4, k5, k6 = jax.random.split(key, 6)
    N, C, H, W = 2, 4, 16, 16
    pred = jax.random.normal(k1, (N, C, H, W), dtype=jnp.float32)
    gt = jax.random.normal(k2, (N, C, H, W), dtype=jnp.float32)
    mask = (jax.random.uniform(k3, (N, C, H, W)) > 0.3).astype(jnp.float32)

    loss = jax.block_until_ready(heatmap_loss(pred, gt, mask))
    ref = jnp.mean((pred - gt) ** 2 * mask)
    assert jnp.allclose(loss, ref, rtol=1e-5, atol=1e-6), (loss, ref)

    # Secondary check: awkward shape exercising the pad fallback + row mask.
    pred2 = jax.random.normal(k4, (2, 3, 15, 17), dtype=jnp.float32)
    gt2 = jax.random.normal(k5, (2, 3, 15, 17), dtype=jnp.float32)
    mask2 = (jax.random.uniform(k6, (2, 3, 15, 17)) > 0.3).astype(jnp.float32)
    loss2 = jax.block_until_ready(heatmap_loss(pred2, gt2, mask2))
    ref2 = jnp.mean((pred2 - gt2) ** 2 * mask2)
    assert jnp.allclose(loss2, ref2, rtol=1e-5, atol=1e-6), (loss2, ref2)

    print("KERNEL_OK")
</pallas_src>

<mosaic_0001>
module attributes {stable_mosaic.version = 11 : i64} {
  func.func @_heatmap_loss_kernel(%arg0: i32, %arg1: i32, %arg2: memref<8x256xf32, #tpu.memory_space<vmem>>, %arg3: memref<8x256xf32, #tpu.memory_space<vmem>>, %arg4: memref<8x256xf32, #tpu.memory_space<vmem>>, %arg5: memref<1x8x256xf32, #tpu.memory_space<vmem>>) attributes {dimension_semantics = [#tpu.dimension_semantics<parallel>, #tpu.dimension_semantics<arbitrary>], iteration_bounds = array<i64: 2, 1>, scalar_prefetch = 0 : i64, scratch_operands = 0 : i64, tpu.core_type = #tpu.core_type<tc>, window_params = [{transform_indices = @transform_0, window_bounds = array<i64: 8, 256>}, {transform_indices = @transform_1, window_bounds = array<i64: 8, 256>}, {transform_indices = @transform_2, window_bounds = array<i64: 8, 256>}, {transform_indices = @transform_3, window_bounds = array<i64: 1, 8, 256>}]} {
    %c0_i32 = arith.constant 0 : i32
    %0 = arith.cmpi eq, %arg1, %c0_i32 : i32
    %1 = arith.extui %0 : i1 to i32
    %c0_i32_0 = arith.constant 0 : i32
    %2 = arith.cmpi ne, %1, %c0_i32_0 : i32
    scf.if %2 {
      %cst_14 = arith.constant 0.000000e+00 : f32
      %25 = vector.broadcast %cst_14 : f32 to vector<1x8x256xf32>
      %c0_15 = arith.constant 0 : index
      %c0_16 = arith.constant 0 : index
      %c0_17 = arith.constant 0 : index
      %26 = vector.load %arg5[%c0_15, %c0_16, %c0_17] : memref<1x8x256xf32, #tpu.memory_space<vmem>>, vector<1x8x256xf32>
      tpu.vector_store %arg5[%c0_15, %c0_16, %c0_17], %25 {strides = array<i32>} : memref<1x8x256xf32, #tpu.memory_space<vmem>>, vector<1x8x256xf32>,
    } else {
    }
    %c0 = arith.constant 0 : index
    %c0_1 = arith.constant 0 : index
    %3 = vector.load %arg2[%c0, %c0_1] : memref<8x256xf32, #tpu.memory_space<vmem>>, vector<8x256xf32>
    %c0_2 = arith.constant 0 : index
    %c0_3 = arith.constant 0 : index
    %4 = vector.load %arg3[%c0_2, %c0_3] : memref<8x256xf32, #tpu.memory_space<vmem>>, vector<8x256xf32>
    %5 = arith.subf %3, %4 : vector<8x256xf32>
    %6 = arith.mulf %5, %5 : vector<8x256xf32>
    %c0_4 = arith.constant 0 : index
    %c0_5 = arith.constant 0 : index
    %7 = vector.load %arg4[%c0_4, %c0_5] : memref<8x256xf32, #tpu.memory_space<vmem>>, vector<8x256xf32>
    %8 = arith.mulf %6, %7 : vector<8x256xf32>
    %c1_i32 = arith.constant 1 : i32
    %9 = arith.muli %arg0, %c1_i32 : i32
    %10 = arith.addi %9, %arg1 : i32
    %c8_i32 = arith.constant 8 : i32
    %11 = arith.muli %10, %c8_i32 : i32
    %12 = tpu.iota {dimensions = array<i32: 0>} : vector<8x256xi32>
    %13 = vector.broadcast %11 : i32 to vector<8x256xi32>
    %14 = arith.addi %13, %12 : vector<8x256xi32>
    %c8_i32_6 = arith.constant 8 : i32
    %15 = vector.broadcast %c8_i32_6 : i32 to vector<8x256xi32>
    %16 = arith.cmpi slt, %14, %15 : vector<8x256xi32>
    %cst = arith.constant 0.000000e+00 : f32
    %17 = vector.broadcast %cst : f32 to vector<8x256xf32>
    %18 = arith.select %16, %8, %17 : vector<8x256xi1>, vector<8x256xf32>
    %19 = vector.shape_cast %18 : vector<8x256xf32> to vector<1x8x256xf32>
    %cst_7 = arith.constant dense<0.000000e+00> : vector<8x256xf32>
    %20 = vector.multi_reduction <add>, %19, %cst_7 [0] : vector<1x8x256xf32> to vector<8x256xf32>
    %c0_8 = arith.constant 0 : index
    %c0_9 = arith.constant 0 : index
    %c0_10 = arith.constant 0 : index
    %21 = vector.load %arg5[%c0_8, %c0_9, %c0_10] : memref<1x8x256xf32, #tpu.memory_space<vmem>>, vector<1x8x256xf32>
    %22 = vector.shape_cast %20 : vector<8x256xf32> to vector<1x8x256xf32>
    %23 = arith.addf %21, %22 : vector<1x8x256xf32>
    %c0_11 = arith.constant 0 : index
    %c0_12 = arith.constant 0 : index
    %c0_13 = arith.constant 0 : index
    %24 = vector.load %arg5[%c0_11, %c0_12, %c0_13] : memref<1x8x256xf32, #tpu.memory_space<vmem>>, vector<1x8x256xf32>
    tpu.vector_store %arg5[%c0_11, %c0_12, %c0_13], %23 {strides = array<i32>} : memref<1x8x256xf32, #tpu.memory_space<vmem>>, vector<1x8x256xf32>,
    return
  }
  func.func @transform_0(%arg0: i32, %arg1: i32) -> (i32, i32) {
    %c1_i32 = arith.constant 1 : i32
    %0 = arith.muli %arg0, %c1_i32 : i32
    %1 = arith.addi %0, %arg1 : i32
    %c0_i32 = arith.constant 0 : i32
    %2 = arith.minsi %1, %c0_i32 : i32
    %c0_i32_0 = arith.constant 0 : i32
    %c0_i32_1 = arith.constant 0 : i32
    return %2, %c0_i32_0 : i32, i32
  }
  func.func @transform_1(%arg0: i32, %arg1: i32) -> (i32, i32) {
    %c1_i32 = arith.constant 1 : i32
    %0 = arith.muli %arg0, %c1_i32 : i32
    %1 = arith.addi %0, %arg1 : i32
    %c0_i32 = arith.constant 0 : i32
    %2 = arith.minsi %1, %c0_i32 : i32
    %c0_i32_0 = arith.constant 0 : i32
    %c0_i32_1 = arith.constant 0 : i32
    return %2, %c0_i32_0 : i32, i32
  }
  func.func @transform_2(%arg0: i32, %arg1: i32) -> (i32, i32) {
    %c1_i32 = arith.constant 1 : i32
    %0 = arith.muli %arg0, %c1_i32 : i32
    %1 = arith.addi %0, %arg1 : i32
    %c0_i32 = arith.constant 0 : i32
    %2 = arith.minsi %1, %c0_i32 : i32
    %c0_i32_0 = arith.constant 0 : i32
    %c0_i32_1 = arith.constant 0 : i32
    return %2, %c0_i32_0 : i32, i32
  }
  func.func @transform_3(%arg0: i32, %arg1: i32) -> (i32, i32, i32) {
    %c0_i32 = arith.constant 0 : i32
    %c0_i32_0 = arith.constant 0 : i32
    %c0_i32_1 = arith.constant 0 : i32
    return %arg0, %c0_i32, %c0_i32_0 : i32, i32, i32
  }
}

</mosaic_0001>

<bundles_post_ra>
// kernel: tpu_custom_call.1
= control target key start
LH: loop header
LB: loop body
LE: loop exit
PB: predicated region body
PF: predicated region fallthrough
CT: control target
= control target key end

     0   :  { %s1055_s0 = inlined_call_operand.hbm [shape: f32[8,256], index: 0, kind: input, shape index: {}]   ;;  %s1056_s1 = inlined_call_operand.hbm [shape: f32[8,256], index: 1, kind: input, shape index: {}]   ;;  %s1057_s2 = inlined_call_operand.hbm [shape: f32[8,256], index: 2, kind: input, shape index: {}]   ;;  %s1058_s3 = inlined_call_operand.hbm [shape: f32[2,8,256], index: 3, kind: output, shape index: {}]  }
   0x1   :  { %1064 = sst [smem:[#allocation13_spill]] %s1056_s1 }
   0x2   :  { %8 = vsyncpa [#allocation3], 0 }
   0x3   :  { %10 = vsyncpa [#allocation3 + $0x1], 0 }
   0x4   :  { %11 = vsyncpa [#allocation6], 0 }
   0x5   :  { %13 = vsyncpa [#allocation6 + $0x1], 0 }
   0x6   :  { %14 = vsyncpa [#allocation4], 0 }
   0x7   :  { %16 = vsyncpa [#allocation4 + $0x1], 0  ;;  %s827_s12 = smov 0   ;;  %s829_s13 = smov 0  }
   0x8   :  { %s831_s14 = smov 0   ;;  %s833_s15 = smov 0  }
   0x9   :  { %s835_s16 = smov 0   ;;  %s837_s17 = smov 0  }
   0xa   :  { %s839_s18 = smov 0   ;;  %s841_s19 = smov 0  }
   0xb LB: > { %s866_s20 = sadd.s32 4294967295, %s801_s19   ;;  %s480_s21 = sadd.s32 4294967294, %s801_s19   ;;  %s801_s19 = sphi %s841_s19, %s22_s19   ;;  %s797_s18 = sphi %s839_s18, %s1089_s18   ;;  %s793_s17 = sphi %s837_s17, %s1088_s17   ;;  %s789_s16 = sphi %s835_s16, %s1045_s16   ;;  %s785_s15 = sphi %s833_s15, %s1087_s15   ;;  %s781_s14 = sphi %s831_s14, %s1086_s14   ;;  %s777_s13 = sphi %s829_s13, %s1085_s13   ;;  %s773_s12 = sphi %s827_s12, %s1084_s12  }
   0xc   : > { %s34_s22 = sadd.s32 1, %s797_s18  ;;  %p770_p1 = scmp.ne.s32.totalorder %s789_s16, 0 }
   0xd   : > { %p36_p0 = scmp.ge.s32.totalorder %s34_s22, 2  ;;  %p55_p2 = scmp.eq.s32.totalorder %s801_s19, 0 }
   0xe   : > { %p60_p3 = scmp.ne.s32.totalorder %s789_s16, %s785_s15  ;;  %p61_p5 = scmp.eq.s32.totalorder %s866_s20, 0 }
   0xf   : > { %s1091_s22 = smov (%p36_p0, %s34_s22), 0  ;;  %p875_p4 = por %p770_p1, %p55_p2 }
  0x10   : > { %1065 = sst [smem:[#allocation12_spill]] %s1091_s22  ;;  %p880_p6 = por %p61_p5, %p60_p3 }
  0x11   : > { %s134_s25 = ssub.s32 %s797_s18, %s1091_s22  ;;  %s137_s26 = sadd.s32 1, %s781_s14 }
  0x12   : > { %s1067_s24 = scalar_select %p880_p6, 1, 0 }
  0x13   : > { %p135_p7 = scmp.eq.s32.totalorder %s134_s25, 0  ;;  %p147_p8 = scmp.ne.s32.totalorder %s781_s14, %s777_s13 }
  0x14   : > { %p148_p9 = scmp.eq.s32.totalorder %s866_s20, 1  ;;  %p153_p10 = scmp.ne.s32.totalorder %s777_s13, %s773_s12 }
  0x15   : > { %s888_s27 = scalar_select %p135_p7, %s781_s14, %s137_s26  }
  0x16   : > { %p154_p11 = scmp.eq.s32.totalorder %s480_s21, 1  ;;  %p895_p12 = por %p148_p9, %p147_p8 }
  0x17   : > { %p529_p1 = scmp.lt.s32.totalorder %s801_s19, 2  ;;  %s196_s4 = sand.u32 1, %s801_s19  }
  0x18   : > { %s1068_s28 = scalar_select %p895_p12, 1, 0 }
  0x19   : > { %p900_p0 = por %p154_p11, %p153_p10  ;;  %p907_p2 = pnand %p529_p1, %p875_p4 }
  0x1a   : > { %s803_s5 = smov [#allocation5]   ;;  %s913_s7 = scalar_lea.sflag [#allocation6], %s196_s4 }
  0x1b   : > { %s1069_s29 = scalar_select %p900_p0, 1, 0 }
  0x1c   : > { %s1070_s30 = scalar_select %p907_p2, 1, 0 }
  0x1d   : > { %s211_s6 = sshll.u32 %s803_s5, 4  ;;  %s1071_s1 = sld [smem:[#allocation13_spill]]  ;;  %s212_s6 = int_to_ptr.vmem [resolvable:$true] %s211_s6 }
  0x1e   : > { %p923_p4 = pneg %p907_p2 }
  0x23   : > { %s604_s10 = scalar_lea.hbm %s1071_s1, 256 }
  0x24   : > { %p605_p5 = scmp.ne.s32.totalorder %s1071_s1, %s604_s10  ;;  %p611_p9 = scmp.lt.u32.totalorder %s604_s10, %s604_s10 }
  0x25   : > { %p613_p10 = scmp.lt.u32.totalorder %s604_s10, %s1071_s1 }
  0x26   : > { %p607_p7 = pnand %p923_p4, %p605_p5 }
  0x27   : > { %p614_p11 = por %p613_p10, %p611_p9 }
  0x28   : > { %p608_p8 = pneg %p607_p7 }
  0x2a   : > { %p615_p1 = pnand %p614_p11, %p608_p8 }
  0x2c   : > { %618 = shalt.err (!%p615_p1)
}
  0x2d   : > { %s619_s26 = scalar_lea.vmem %s212_s6, 256  ;;  %s626_s4 = scalar_lea.vmem %s212_s6, 512 }
  0x2e   : > { %p620_p13 = scmp.ne.s32.totalorder %s212_s6, %s619_s26  ;;  %p627_p12 = scmp.lt.s32.totalorder %s212_s6, %s212_s6 }
  0x2f   : > { %p628_p6 = scmp.lt.s32.totalorder %s626_s4, %s619_s26 }
  0x30   : > { %p622_p3 = pnand %p620_p13, %p923_p4 }
  0x31   : > { %p629_p2 = por %p628_p6, %p627_p12 }
  0x32   : > { %p623_p0 = pneg %p622_p3 }
  0x34   : > { %p630_p5 = pnand %p629_p2, %p623_p0 }
  0x36   : > { %633 = shalt.err (!%p630_p5)
}
  0x37   : > { %p1073_p7 = scmp.ne.s32.totalorder %s1070_s30, 0  ;;  %p238_p8 = scmp.lt.s32.totalorder %s801_s19, 3 }
  0x38   : > { %p1074_p9 = scmp.ge.s32.totalorder %s801_s19, 1  ;;  %s804_s10 = smov [#allocation2]  }
  0x39   : > { %521 = dma.hbm_to_vmem [thread:$0]  (!%p1073_p7), %s1071_s1, 256, %s212_s6, %s913_s7  }
  0x3a   : > { %p943_p13 = pnand %p1074_p9, %p238_p8  ;;  %s189_s11 = sshll.u32 %s804_s10, 4  ;;  %s190_s11 = int_to_ptr.vmem [resolvable:$true] %s189_s11 }
  0x3b   : > { %s634_s25 = scalar_lea.hbm %s1055_s0, 256 }
  0x3c   : > { %s1075_s9 = scalar_select %p943_p13, 1, 0 }
  0x3d   : > { %p635_p6 = scmp.ne.s32.totalorder %s1055_s0, %s634_s25  ;;  %p641_p2 = scmp.lt.u32.totalorder %s634_s25, %s634_s25 }
  0x3e   : > { %p643_p3 = scmp.lt.u32.totalorder %s634_s25, %s1055_s0 }
  0x3f   : > { %p637_p12 = pnand %p635_p6, %p923_p4 }
  0x40   : > { %p644_p10 = por %p643_p3, %p641_p2 }
  0x41   : > { %p638_p0 = pneg %p637_p12 }
  0x43   : > { %p645_p11 = pnand %p644_p10, %p638_p0 }
  0x45   : > { %648 = shalt.err (!%p645_p11)
}
  0x46   : > { %s649_s8 = scalar_lea.vmem %s190_s11, 256  ;;  %s656_s10 = scalar_lea.vmem %s190_s11, 512 }
  0x47   : > { %p650_p1 = scmp.ne.s32.totalorder %s190_s11, %s649_s8  ;;  %p657_p9 = scmp.lt.s32.totalorder %s190_s11, %s190_s11 }
  0x48   : > { %p658_p13 = scmp.lt.s32.totalorder %s656_s10, %s649_s8 }
  0x49   : > { %p652_p5 = pnand %p650_p1, %p923_p4 }
  0x4a   : > { %p659_p7 = por %p658_p13, %p657_p9 }
  0x4b   : > { %p653_p8 = pneg %p652_p5 }
  0x4d   : > { %p660_p6 = pnand %p659_p7, %p653_p8 }
  0x4f   : > { %663 = shalt.err (!%p660_p6)
}
  0x50   : > { %p1076_p12 = scmp.ne.s32.totalorder %s1070_s30, 0  ;;  %s805_s25 = smov [#allocation7]  }
  0x51   : > { %s233_s26 = sshll.u32 %s805_s25, 4  ;;  %s664_s5 = scalar_lea.hbm %s1057_s2, 256  ;;  %s234_s26 = int_to_ptr.vmem [resolvable:$true] %s233_s26 }
  0x52   : > { %518 = dma.hbm_to_vmem [thread:$0]  (!%p1076_p12), %s1055_s0, 256, %s190_s11, [#allocation3]  }
  0x53   : > { %p665_p13 = scmp.ne.s32.totalorder %s1057_s2, %s664_s5  ;;  %p671_p2 = scmp.lt.u32.totalorder %s664_s5, %s664_s5 }
  0x54   : > { %p673_p3 = scmp.lt.u32.totalorder %s664_s5, %s1057_s2 }
  0x55   : > { %p667_p7 = pnand %p665_p13, %p923_p4 }
  0x56   : > { %p674_p10 = por %p673_p3, %p671_p2 }
  0x57   : > { %p668_p0 = pneg %p667_p7 }
  0x59   : > { %p675_p11 = pnand %p674_p10, %p668_p0 }
  0x5b   : > { %678 = shalt.err (!%p675_p11)
}
  0x5c   : > { %s679_s11 = scalar_lea.vmem %s234_s26, 256  ;;  %s686_s15 = scalar_lea.vmem %s234_s26, 512 }
  0x5d   : > { %p680_p1 = scmp.ne.s32.totalorder %s234_s26, %s679_s11  ;;  %p687_p9 = scmp.lt.s32.totalorder %s234_s26, %s234_s26 }
  0x5e   : > { %p688_p6 = scmp.lt.s32.totalorder %s686_s15, %s679_s11 }
  0x5f   : > { %p682_p5 = pnand %p680_p1, %p923_p4 }
  0x60   : > { %p689_p12 = por %p688_p6, %p687_p9 }
  0x61   : > { %p683_p8 = pneg %p682_p5 }
  0x63   : > { %p690_p13 = pnand %p689_p12, %p683_p8 }
  0x65   : > { %693 = shalt.err (!%p690_p13)
}
  0x66   : > { %p1077_p7 = scmp.ne.s32.totalorder %s1070_s30, 0  ;;  %p1078_p0 = scmp.ne.s32.totalorder %s1075_s9, 0 }
  0x67   : > { %s244_s21 = sand.u32 (!%p1078_p0), 1, %s789_s16   ;;  %p1079_p4 = scmp.ne.s32.totalorder (!%p1078_p0), %s1067_s24, 0 }
  0x68   : > { %524 = dma.hbm_to_vmem [thread:$0]  (!%p1077_p7), %s1057_s2, 256, %s234_s26, %s913_s7  }
  0x69   : > { %242 = sbr.rel (%p1078_p0) target bundleno = 144 (0x90), region = 32  ;;  %s493_s23 = sshll.u32 (!%p1078_p0), %s244_s21, 4 }
  0x6a   : > { %s245_s25 = scalar_lea.sflag (!%p1078_p0), [#allocation3], %s244_s21  ;;  %s248_s4 = scalar_lea.vmem (!%p1078_p0), [#allocation2], %s493_s23 }
  0x70   : > { %759 = dma.done.wait (%p1079_p4), %s245_s25, 256  }
  0x71   : > { %761 = vsyncadd (%p1079_p4), %s245_s25, 4294967040  ;;  %s253_s30 = sand.u32 1, %s866_s20   ;;  %s257_s5 = scalar_lea.vmem [#allocation5], %s493_s23 }
  0x72   : > { %s254_s6 = scalar_lea.sflag [#allocation6], %s253_s30 }
  0x73   : > { %763 = dma.done.wait (%p1079_p4), %s254_s6, 512  }
  0x74   : > { %765 = vsyncadd (%p1079_p4), %s254_s6, 4294966784  ;;  %v328_v0 = vlaneseq  ;;  %s497_s7 = sshll.u32 %s793_s17, 3  ;;  %s296_s9 = sand.u32 1, %s777_s13   ;;  %v314_v3 = vld [vmem:[%s248_s4] sm:$0xff]  ;;  %v315_v7 = vld [vmem:[%s248_s4 + $0x8] sm:$0xff] }
  0x75   : > { %v330_v2 = vstv %s497_s7  ;;  %s496_s26 = sshll.u32 %s296_s9, 4  ;;  %v316_v4 = vld [vmem:[%s257_s5] sm:$0xff]  ;;  %v317_v8 = vld [vmem:[%s257_s5 + $0x8] sm:$0xff]  ;;  %s266_s20 = scalar_lea.vmem [#allocation7], %s493_s23 }
  0x76   : > { %v329_v1 = vshrl.u32 %v328_v0, 7  ;;  %v318_v6 = vsub.f32 %v314_v3, %v316_v4  ;;  %v322_v9 = vld [vmem:[%s266_s20] sm:$0xff]  ;;  %v319_v10 = vsub.f32 %v315_v7, %v317_v8  ;;  %v323_v12 = vld [vmem:[%s266_s20 + $0x8] sm:$0xff]  ;;  %s506_s24 = sshll.u32 %s793_s17, 8  ;;  %s298_s8 = scalar_lea.vmem [#allocation8], %s496_s26 }
  0x77   : > { %s358_s10 = sshll.u32 %s298_s8, 4  ;;  %s1002_s1 = scalar_lea.hbm %s1058_s3, %s506_s24  ;;  %s1004_s10 = int_to_ptr.vmem [resolvable:$true] %s358_s10 }
  0x78   : > { %v331_v5 = vadd.s32 %v330_v2, %v329_v1  ;;  %v320_v11 = vmul.f32 %v318_v6, %v318_v6  ;;  %v321_v13 = vmul.f32 %v319_v10, %v319_v10  ;;  %s344_s22 = scalar_lea.sflag [#allocation4], %s296_s9  ;;  %s694_s21 = scalar_lea.vmem %s1004_s10, 256 }
  0x79   : > { %p695_p12 = scmp.ne.s32.totalorder %s1004_s10, %s694_s21  ;;  %p1080_p2 = scmp.ne.s32.totalorder %s1068_s28, 0 }
  0x7a   : > { %vm332_vm0 = vcmp.lt.s32.totalorder %v331_v5, 8  ;;  %v324_v14 = vmul.f32 %v322_v9, %v320_v11  ;;  %v325_v15 = vmul.f32 %v323_v12, %v321_v13  ;;  %s806_s17 = smov [#allocation8]  }
  0x7b   : > { %p696_p3 = pnand %p695_p12, %p1080_p2  ;;  %s698_s23 = sshll.u32 %s806_s17, 4  ;;  %s699_s23 = int_to_ptr.vmem [resolvable:$false] %s698_s23 }
  0x7c   : > { %v333_v16 = vsel %vm332_vm0, %v324_v14, 0.0  ;;  %v334_v17 = vsel %vm332_vm0, %v325_v15, 0.0  ;;  %s700_s25 = scalar_lea.vmem %s699_s23, 512  ;;  %p701_p11 = scmp.lt.s32.totalorder %s1004_s10, %s699_s23 }
  0x7d   : > { %341 = vst [vmem:[%s298_s8] sm:$0xff] %v333_v16  ;;  %342 = vst [vmem:[%s298_s8 + $0x8] sm:$0xff] %v334_v17  ;;  %p697_p10 = pneg %p696_p3  ;;  %p702_p1 = scmp.lt.s32.totalorder %s700_s25, %s694_s21 }
  0x7f   : > { %p703_p5 = por %p702_p1, %p701_p11 }
  0x81   : > { %p704_p8 = pnand %p703_p5, %p697_p10 }
  0x83   : > { %707 = shalt.err (!%p704_p8)
}
  0x84   : > { %s708_s4 = scalar_lea.hbm %s1002_s1, 256  ;;  %s712_s5 = scalar_lea.hbm %s1058_s3, 512 }
  0x85   : > { %p709_p9 = scmp.ne.s32.totalorder %s1002_s1, %s708_s4  ;;  %p713_p7 = scmp.lt.u32.totalorder %s1002_s1, %s1058_s3 }
  0x86   : > { %p714_p0 = scmp.lt.u32.totalorder %s712_s5, %s708_s4  ;;  %p716_p12 = scmp.lt.u32.totalorder %s708_s4, %s1002_s1 }
  0x87   : > { %p710_p6 = pnand %p709_p9, %p1080_p2 }
  0x88   : > { %p715_p4 = por %p714_p0, %p713_p7 }
  0x89   : > { %p711_p13 = pneg %p710_p6 }
  0x8a   : > { %p717_p3 = por %p716_p12, %p715_p4 }
  0x8c   : > { %p718_p10 = pnand %p717_p3, %p711_p13 }
  0x8e   : > { %721 = shalt.err (!%p718_p10)
}
  0x8f   : > { %513 = dma.vmem_to_hbm [thread:$0]  (%p1080_p2), %s1004_s10, 256, %s1002_s1, %s344_s22  }
  0x90 PF: > { %s370_s26 = sand.u32 1, %s773_s12   ;;  %p1081_p11 = scmp.ne.s32.totalorder %s1069_s29, 0 }
  0x91   : > { %p1082_p1 = scmp.ge.s32.totalorder %s801_s19, 2  ;;  %s371_s20 = scalar_lea.sflag [#allocation4], %s370_s26 }
  0x93   : > { %p526_p5 = pnand %p1082_p1, %p1081_p11 }
  0x95   : > { %767 = dma.done.wait (!%p526_p5), %s371_s20, 256  }
  0x96   : > { %769 = vsyncadd (!%p526_p5), %s371_s20, 4294967040  ;;  %s22_s19 = sadd.s32 1, %s801_s19   ;;  %s1083_s28 = sld [smem:[#allocation12_spill]] }
  0x97   : > { %p19_p8 = scmp.ge.s32.totalorder %s22_s19, 4   ;;  %s1084_s12 = smov %s777_s13 }
  0x98   : > { %s1085_s13 = smov %s781_s14  ;;  %s1086_s14 = smov %s888_s27 }
  0x99   : > { %s1087_s15 = smov %s789_s16  ;;  %s1045_s16 = smov 0  }
  0x9a   : > { %s1088_s17 = smov %s797_s18  ;;  %21 = sbr.rel (!%p19_p8) target bundleno = 11 (0xb), region = 105 }
  0x9c   : > { %s1089_s18 = smov %s1083_s28 }
  0xa1   :  { %376 = vsyncpa [#allocation3], 1 }
  0xa2   :  { %378 = vsyncpa [#allocation3 + $0x1], 1 }
  0xa3   :  { %379 = vsyncpa [#allocation6], 1 }
  0xa4   :  { %381 = vsyncpa [#allocation6 + $0x1], 1 }
  0xa5   :  { %382 = vsyncpa [#allocation4], 1 }
  0xa6   :  { %384 = vsyncpa [#allocation4 + $0x1], 1 }

</bundles_post_ra>
